<compile_context>
chip_gen: v6e
topology: v6e:2x2x1
jax: 0.10.0
libtpu: 0.0.40
codegen_flags: <defaults>
</compile_context>

<pallas_src>
import functools
import math

import jax
import jax.numpy as jnp
from jax.experimental import pallas as pl
from jax.experimental.pallas import tpu as pltpu


def _round_up(x, m):
    return ((x + m - 1) // m) * m


def _pick_px_tile(pp, batch, cap=2048):
    """Largest 128-multiple divisor of pp (<= cap); shrink so the grid has >= 2
    parallel blocks (keeps both TensorCores busy on v7x / megacore)."""
    divisors = [t for t in range(128, min(pp, cap) + 1, 128) if pp % t == 0]
    if not divisors:
        return pp
    best = divisors[-1]
    if batch * (pp // best) < 2:
        for t in reversed(divisors):
            if batch * (pp // t) >= 2:
                best = t
                break
    return best


# ------------------------------------------------------------------ fused whole-MLP kernel
def _mlp_kernel(*refs, n_hidden_layers):
    """Whole-MLP body for one (sample, pixel-tile) grid point.

    refs = [x, (w, shift) * n_hidden_layers, w_fin, b_fin, out]
      x:     (C_in, tpx)    f32   (channels on sublanes, pixels on lanes)
      w:     (C_out, C_in)  bf16  (BN scale pre-folded into rows)
      shift: (C_out, 1)     f32
      out:   (n_classes, tpx) f32
    """
    x_ref = refs[0]
    o_ref = refs[-1]
    h = x_ref[...].astype(jnp.bfloat16)              # bf16 MXU operand
    idx = 1
    for _ in range(n_hidden_layers):
        w_ref, s_ref = refs[idx], refs[idx + 1]
        idx += 2
        y = jnp.dot(w_ref[...], h, preferred_element_type=jnp.float32)   # f32 acc
        y = jnp.maximum(y + s_ref[...], 0.0)          # f32 epilogue: BN shift + ReLU
        h = y.astype(jnp.bfloat16)
    wf_ref, bf_ref = refs[idx], refs[idx + 1]
    out = jnp.dot(wf_ref[...], h, preferred_element_type=jnp.float32) + bf_ref[...]
    o_ref[...] = out.astype(o_ref.dtype)


def mlp_pallas(x_ncp, layers, w_fin, b_fin):
    """x_ncp: (N, C, P) f32.  layers: list of (w_bf16 (Co,Ci), shift_f32 (Co,1)).
    w_fin: (n_classes, Ci) bf16, b_fin: (n_classes, 1) f32.  Returns (N, n_classes, P) f32."""
    N, C, P = x_ncp.shape
    n_classes = w_fin.shape[0]

    # Pixel axis padded to a 128-multiple only if needed (demo: P=256, no pad).
    Pp = _round_up(P, 128)
    if Pp != P:
        x_ncp = jnp.pad(x_ncp, ((0, 0), (0, 0), (0, Pp - P)))
    tpx = _pick_px_tile(Pp, N)
    grid = (N, Pp // tpx)

    in_specs = [pl.BlockSpec((None, C, tpx), lambda n, p: (n, 0, p))]
    operands = [x_ncp]
    for w, sh in layers:
        co, ci = w.shape
        in_specs.append(pl.BlockSpec((co, ci), lambda n, p: (0, 0)))   # resident weight
        in_specs.append(pl.BlockSpec((co, 1), lambda n, p: (0, 0)))    # resident shift
        operands.extend([w, sh])
    in_specs.append(pl.BlockSpec(tuple(w_fin.shape), lambda n, p: (0, 0)))
    in_specs.append(pl.BlockSpec((n_classes, 1), lambda n, p: (0, 0)))
    operands.extend([w_fin, b_fin])

    # VMEM budget from actual tile footprint (double-buffered x/out, resident weights,
    # f32+bf16 intermediates); capped so a v7x-sized (64 MiB) budget is never exceeded
    # by the limit request itself.
    pad8 = lambda v: _round_up(v, 8)
    widths = [C, n_classes] + [w.shape[0] for w, _ in layers]
    est = 2 * pad8(C) * tpx * 4 + 2 * pad8(n_classes) * tpx * 4
    for w, _ in layers + [(w_fin, b_fin)]:
        co, ci = w.shape
        est += 2 * pad8(co) * _round_up(ci, 128) * 2      # bf16 weight tiles
        est += 2 * pad8(co) * 128 * 4                     # (Co,1) f32 shift, lane-padded
    est += 2 * max(pad8(wd) for wd in widths) * tpx * 6   # layer intermediates
    vmem_limit = int(min(56 * 2**20, max(32 * 2**20, 2 * est)))

    out = pl.pallas_call(
        functools.partial(_mlp_kernel, n_hidden_layers=len(layers)),
        out_shape=jax.ShapeDtypeStruct((N, n_classes, Pp), jnp.float32),
        grid=grid,
        in_specs=in_specs,
        out_specs=pl.BlockSpec((None, n_classes, tpx), lambda n, p: (n, 0, p)),
        compiler_params=pltpu.CompilerParams(
            dimension_semantics=("parallel", "parallel"),
            vmem_limit_bytes=vmem_limit),
    )(*operands)

    if Pp != P:
        out = out[:, :, :P]
    return out


# ----------------------------------------------------------------- params / forward
def init_mlp_params(key, n_input, n_classes, n_hidden=512, n_hidden_layers=1):
    """Deterministic stand-in weights matching the PyTorch module's structure."""
    params = {"hidden": []}
    n_feats = n_input
    keys = jax.random.split(key, 2 * n_hidden_layers + 2)
    ki = 0
    for _ in range(n_hidden_layers):
        bound = 1.0 / math.sqrt(n_feats)
        w = jax.random.uniform(keys[ki], (n_hidden, n_feats, 1, 1),
                               jnp.float32, -bound, bound)           # Conv2d layout
        ki += 1
        k1, k2, k3, k4 = jax.random.split(keys[ki], 4)
        ki += 1
        bn = {"gamma": 1.0 + 0.1 * jax.random.normal(k1, (n_hidden,), jnp.float32),
              "beta": 0.05 * jax.random.normal(k2, (n_hidden,), jnp.float32),
              "mean": 0.05 * jax.random.normal(k3, (n_hidden,), jnp.float32),
              "var": 1.0 + 0.1 * jax.random.uniform(k4, (n_hidden,), jnp.float32)}
        params["hidden"].append({"w": w, "bn": bn})
        n_feats = n_hidden
    bound = 1.0 / math.sqrt(n_feats)
    params["w_fin"] = jax.random.uniform(keys[ki], (n_classes, n_feats, 1, 1),
                                         jnp.float32, -bound, bound)
    ki += 1
    params["b_fin"] = jax.random.uniform(keys[ki], (n_classes,),
                                         jnp.float32, -bound, bound)
    return params


@functools.partial(jax.jit, static_argnames=("n_classes", "n_hidden_layers"))
def mlp_forward(params, x_nchw, *, n_classes, n_hidden_layers=1):
    """Inference-mode forward of MLP (ndim=2): NCHW in, NCHW out."""
    if n_hidden_layers == -1:
        return x_nchw[:, :n_classes]

    N, C, H, W = x_nchw.shape
    # Pixels go on the lane axis: plain reshape, no transpose / layout change.
    x = x_nchw.reshape(N, C, H * W).astype(jnp.float32)

    # Fold eval-mode BatchNorm: y = scale*(W@x) + shift == (scale⊙W)@x + shift.
    layers = []
    for lyr in params["hidden"]:
        w = lyr["w"]
        w2d = w.reshape(w.shape[0], w.shape[1]).astype(jnp.float32)   # (Cout, Cin)
        bn = lyr["bn"]
        scale = bn["gamma"] * jax.lax.rsqrt(bn["var"] + 1e-5)
        shift = bn["beta"] - bn["mean"] * scale
        w_folded = (w2d * scale[:, None]).astype(jnp.bfloat16)
        layers.append((w_folded, shift.reshape(-1, 1).astype(jnp.float32)))

    wf = params["w_fin"]
    w_fin = wf.reshape(wf.shape[0], wf.shape[1]).astype(jnp.bfloat16)  # (n_classes, Cin)
    b_fin = params["b_fin"].reshape(-1, 1).astype(jnp.float32)

    out = mlp_pallas(x, layers, w_fin, b_fin)           # (N, n_classes, H*W)
    return out.reshape(N, n_classes, H, W)


if __name__ == "__main__":
    # TODO(synk): training-mode Dropout2d / BatchNorm statistic updates are not
    # implemented (inference semantics only), matching model.eval() behavior.
    n_input, n_classes, n_hidden, n_hidden_layers = 4, 6, 32, 1
    key = jax.random.PRNGKey(0)
    kx, kp = jax.random.split(key)

    x = jax.random.normal(kx, (2, n_input, 16, 16), jnp.float32)
    params = init_mlp_params(kp, n_input, n_classes, n_hidden, n_hidden_layers)

    out = mlp_forward(params, x, n_classes=n_classes,
                      n_hidden_layers=n_hidden_layers)
    out = jax.block_until_ready(out)

    assert out.shape == (2, n_classes, 16, 16), out.shape
    assert bool(jnp.all(jnp.isfinite(out)))
    print("KERNEL_OK")
</pallas_src>

<mosaic_0001>
module attributes {stable_mosaic.version = 11 : i64} {
  func.func @_mlp_kernel(%arg0: i32, %arg1: i32, %arg2: memref<1x4x256xf32, #tpu.memory_space<vmem>>, %arg3: memref<32x4xbf16, #tpu.memory_space<vmem>>, %arg4: memref<32x1xf32, #tpu.memory_space<vmem>>, %arg5: memref<6x32xbf16, #tpu.memory_space<vmem>>, %arg6: memref<6x1xf32, #tpu.memory_space<vmem>>, %arg7: memref<1x6x256xf32, #tpu.memory_space<vmem>>) attributes {dimension_semantics = [#tpu.dimension_semantics<parallel>, #tpu.dimension_semantics<parallel>], iteration_bounds = array<i64: 2, 1>, scalar_prefetch = 0 : i64, scratch_operands = 0 : i64, tpu.core_type = #tpu.core_type<tc>, window_params = [{transform_indices = @transform_0, window_bounds = array<i64: 1, 4, 256>}, {pipeline_mode = #tpu.pipeline_mode<synchronous>, transform_indices = @transform_1, window_bounds = array<i64: 32, 4>}, {pipeline_mode = #tpu.pipeline_mode<synchronous>, transform_indices = @transform_2, window_bounds = array<i64: 32, 1>}, {pipeline_mode = #tpu.pipeline_mode<synchronous>, transform_indices = @transform_3, window_bounds = array<i64: 6, 32>}, {pipeline_mode = #tpu.pipeline_mode<synchronous>, transform_indices = @transform_4, window_bounds = array<i64: 6, 1>}, {transform_indices = @transform_5, window_bounds = array<i64: 1, 6, 256>}]} {
    %c0 = arith.constant 0 : index
    %c0_0 = arith.constant 0 : index
    %c0_1 = arith.constant 0 : index
    %0 = vector.load %arg2[%c0, %c0_0, %c0_1] : memref<1x4x256xf32, #tpu.memory_space<vmem>>, vector<1x4x256xf32>
    %1 = vector.shape_cast %0 : vector<1x4x256xf32> to vector<4x256xf32>
    %2 = arith.truncf %1 : vector<4x256xf32> to vector<4x256xbf16>
    %c0_2 = arith.constant 0 : index
    %c0_3 = arith.constant 0 : index
    %3 = vector.load %arg3[%c0_2, %c0_3] : memref<32x4xbf16, #tpu.memory_space<vmem>>, vector<32x4xbf16>
    %cst = arith.constant dense<0.000000e+00> : vector<32x256xf32>
    %4 = tpu.matmul %3, %2, %cst {dimension_numbers = #tpu.dot_dimension_numbers<[1], [0], [0], [1], [0, 0, 1, 1], [], []>} : vector<32x4xbf16>, vector<4x256xbf16>, vector<32x256xf32> -> vector<32x256xf32>
    %c0_4 = arith.constant 0 : index
    %c0_5 = arith.constant 0 : index
    %5 = vector.load %arg4[%c0_4, %c0_5] : memref<32x1xf32, #tpu.memory_space<vmem>>, vector<32x1xf32>
    %6 = vector.broadcast %5 : vector<32x1xf32> to vector<32x256xf32>
    %7 = arith.addf %4, %6 : vector<32x256xf32>
    %cst_6 = arith.constant 0.000000e+00 : f32
    %8 = vector.broadcast %cst_6 : f32 to vector<32x256xf32>
    %9 = arith.maximumf %7, %8 : vector<32x256xf32>
    %10 = arith.truncf %9 : vector<32x256xf32> to vector<32x256xbf16>
    %c0_7 = arith.constant 0 : index
    %c0_8 = arith.constant 0 : index
    %11 = vector.load %arg5[%c0_7, %c0_8] : memref<6x32xbf16, #tpu.memory_space<vmem>>, vector<6x32xbf16>
    %cst_9 = arith.constant dense<0.000000e+00> : vector<6x256xf32>
    %12 = tpu.matmul %11, %10, %cst_9 {dimension_numbers = #tpu.dot_dimension_numbers<[1], [0], [0], [1], [0, 0, 1, 1], [], []>} : vector<6x32xbf16>, vector<32x256xbf16>, vector<6x256xf32> -> vector<6x256xf32>
    %c0_10 = arith.constant 0 : index
    %c0_11 = arith.constant 0 : index
    %13 = vector.load %arg6[%c0_10, %c0_11] : memref<6x1xf32, #tpu.memory_space<vmem>>, vector<6x1xf32>
    %14 = vector.broadcast %13 : vector<6x1xf32> to vector<6x256xf32>
    %15 = arith.addf %12, %14 : vector<6x256xf32>
    %c0_12 = arith.constant 0 : index
    %c0_13 = arith.constant 0 : index
    %c0_14 = arith.constant 0 : index
    %16 = vector.load %arg7[%c0_12, %c0_13, %c0_14] : memref<1x6x256xf32, #tpu.memory_space<vmem>>, vector<1x6x256xf32>
    %17 = vector.shape_cast %16 : vector<1x6x256xf32> to vector<6x256xf32>
    %18 = vector.shape_cast %15 : vector<6x256xf32> to vector<1x6x256xf32>
    tpu.vector_store %arg7[%c0_12, %c0_13, %c0_14], %18 {strides = array<i32>} : memref<1x6x256xf32, #tpu.memory_space<vmem>>, vector<1x6x256xf32>,
    return
  }
  func.func @transform_0(%arg0: i32, %arg1: i32) -> (i32, i32, i32) {
    %c0_i32 = arith.constant 0 : i32
    %c0_i32_0 = arith.constant 0 : i32
    return %arg0, %c0_i32, %arg1 : i32, i32, i32
  }
  func.func @transform_1(%arg0: i32, %arg1: i32) -> (i32, i32) {
    %c0_i32 = arith.constant 0 : i32
    %c0_i32_0 = arith.constant 0 : i32
    %c0_i32_1 = arith.constant 0 : i32
    return %c0_i32, %c0_i32_0 : i32, i32
  }
  func.func @transform_2(%arg0: i32, %arg1: i32) -> (i32, i32) {
    %c0_i32 = arith.constant 0 : i32
    %c0_i32_0 = arith.constant 0 : i32
    %c0_i32_1 = arith.constant 0 : i32
    return %c0_i32, %c0_i32_0 : i32, i32
  }
  func.func @transform_3(%arg0: i32, %arg1: i32) -> (i32, i32) {
    %c0_i32 = arith.constant 0 : i32
    %c0_i32_0 = arith.constant 0 : i32
    %c0_i32_1 = arith.constant 0 : i32
    return %c0_i32, %c0_i32_0 : i32, i32
  }
  func.func @transform_4(%arg0: i32, %arg1: i32) -> (i32, i32) {
    %c0_i32 = arith.constant 0 : i32
    %c0_i32_0 = arith.constant 0 : i32
    %c0_i32_1 = arith.constant 0 : i32
    return %c0_i32, %c0_i32_0 : i32, i32
  }
  func.func @transform_5(%arg0: i32, %arg1: i32) -> (i32, i32, i32) {
    %c0_i32 = arith.constant 0 : i32
    %c0_i32_0 = arith.constant 0 : i32
    return %arg0, %c0_i32, %arg1 : i32, i32, i32
  }
}

</mosaic_0001>

<bundles_post_ra>
// kernel: mlp_forward.1
= control target key start
LH: loop header
LB: loop body
LE: loop exit
PB: predicated region body
PF: predicated region fallthrough
CT: control target
= control target key end

     0   :  { %s633_s18 = smov 0   ;;  %s635_s19 = smov 0   ;;  %s694_s0 = inlined_call_operand.vmem [shape: f32[2,4,256], index: 0, kind: input, shape index: {}]   ;;  %s695_s1 = inlined_call_operand.vmem [shape: bf16[32,4], index: 1, kind: input, shape index: {}]   ;;  %s696_s2 = inlined_call_operand.vmem [shape: f32[32,1], index: 2, kind: input, shape index: {}]   ;;  %s697_s3 = inlined_call_operand.vmem [shape: bf16[6,32], index: 3, kind: input, shape index: {}]   ;;  %s698_s4 = inlined_call_operand.vmem [shape: f32[6,1], index: 4, kind: input, shape index: {}]   ;;  %s699_s5 = inlined_call_operand.vmem [shape: f32[2,6,256], index: 5, kind: output, shape index: {}]  }
   0x1   :  { %s637_s20 = smov 0  }
   0x2 LB: > { %s27_s21 = sadd.s32 1, %s596_s19  ;;  %p533_p0 = scmp.ge.s32.totalorder %s600_s20, 1  ;;  %s600_s20 = sphi %s637_s20, %s15_s20   ;;  %s596_s19 = sphi %s635_s19, %s701_s19   ;;  %s592_s18 = sphi %s633_s18, %s700_s18  }
   0x3   : > { %p29_p1 = scmp.ge.s32.totalorder %s27_s21, 2  ;;  %p208_p2 = scmp.lt.s32.totalorder %s600_s20, 3 }
   0x5   : > { %s703_s21 = smov (%p29_p1, %s27_s21), 0  ;;  %p209_p3 = pnand %p533_p0, %p208_p2 }
   0x6   : > { %p245_p4 = scmp.lt.s32.totalorder (!%p209_p3), %s592_s18, 1 }
   0x7   : > { %212 = sbr.rel (%p209_p3) target bundleno = 444 (0x1bc), region = 40 }
   0xc   : > { %v602_v0 = vmov 0   ;;  %s705_s18 = smov (!%p245_p4, %s592_s18), 1  ;;  %v275_v1 = vld [vmem:[%s696_s2] sm:$0xff]  ;;  %v277_v2 = vld [vmem:[%s696_s2 + $0x10] sm:$0xff]  ;;  %v276_v3 = vld [vmem:[%s696_s2 + $0x8] sm:$0xff]  ;;  %vm316_vm0 = vcmask 1041408  }
   0xd   : > { %355 = vmatprep.mubr.bf16.mxu0 %v602_v0  ;;  %574 = vset.pattern.permute.xlu1 %v602_v0  ;;  %s546_s26 = sshll.u32 %s705_s18, 3  ;;  %v278_v4 = vld [vmem:[%s696_s2 + $0x18] sm:$0xff]  ;;  %v389_v8 = vld [vmem:[%s698_s4] sm:$0x3f]  ;;  %vm309_vm1 = vcmask 31744   ;;  %v577_v12 = vld [vmem:[%s695_s1 + $0x8] sm:$0xff]  }
   0xe   : > { %573 = vset.pattern.permute.xlu0 %v602_v0  ;;  %431 = vmatprep.mubr.bf16.mxu1 %v602_v0  ;;  %s252_s8 = scalar_lea.vmem %s694_s0, %s546_s26  ;;  %v576_v11 = vld [vmem:[%s695_s1] sm:$0xff]   ;;  %vm395_vm2 = vcmask 261120   ;;  %s547_s17 = sshll.u32 %s705_s18, 4 }
   0xf   : > { %281 = vperm.xlu1 %574, %v275_v1   ;;  %291 = vperm.xlu0 %573, %v277_v2   ;;  %v265_v5 = vld [vmem:[%s252_s8] sm:$0xff]  ;;  %s262_s24 = scalar_lea.vmem %s699_s5, %s547_s17 }
  0x10   : > { %v267_v6 = vcombine.high %v265_v5, %v265_v5  ;;  %v269_v7 = vpack.c.bf16 %v265_v5, %v265_v5  ;;  %v388_v45 = vld [vmem:[%s697_s3] sm:$0x7] }
  0x12   : > { %v270_v9 = vpack.c.bf16 %v267_v6, %v267_v6  ;;  %v318_v10 = vsel %vm316_vm0, %v269_v7, 0 }
  0x13   : > { %286 = vperm.xlu1 %574, %v276_v3   ;;  %296 = vperm.xlu0 %573, %v278_v4  }
  0x14   : > { %540 = vmatprep.subr.msk.bf16.mxu0 %vm316_vm0, %v270_v9 }
  0x15   : > { %338 = vmatpush1.bf16.msra.mxu0 %v318_v10 }
  0x17   : > { %392 = vperm.xlu0 %573, %v389_v8  }
  0x18   : > { %541 = vmatmul.mubr.msk.bf16.vlgmr.msra.gmra.mxu0 %vm309_vm1, %v576_v11 }
  0x19   : > { %365 = vmatprep.mubr.bf16.mxu0 %v602_v0 }
  0x20   : > { %542 = vmatmul.mubr.msk.bf16.gmra.mxu0 %vm309_vm1, %v577_v12 }
  0x8a   : > { %v282_v16 = vpop.permute.xlu1 %281  ;;  %v292_v17 = vpop.permute.xlu0 %291 }
  0x8e   : > { %v287_v21 = vpop.permute.xlu1 %286  ;;  %v297_v22 = vpop.permute.xlu0 %296 }
  0x92   : > { %v393_v46 = vpop.permute.xlu0 %392 }
  0xd8   : > { %v357_v13 = vpop.f32.mrf.mxu0 }
  0xd9   : > { %v358_v36 = vadd.f32 %v357_v13, %v282_v16 }
  0xda   : > { %v359_v14 = vpop.f32.mrf.mxu0 }
  0xdb   : > { %v360_v29 = vadd.f32 %v359_v14, %v282_v16  ;;  %v376_v43 = vmax.f32 %v358_v36, 0.0 }
  0xdc   : > { %v361_v15 = vpop.f32.mrf.mxu0 }
  0xdd   : > { %v362_v31 = vadd.f32 %v361_v15, %v287_v21  ;;  %v377_v38 = vmax.f32 %v360_v29, 0.0 }
  0xde   : > { %v363_v18 = vpop.f32.mrf.mxu0 }
  0xdf   : > { %v364_v24 = vadd.f32 %v363_v18, %v287_v21  ;;  %v378_v40 = vmax.f32 %v362_v31, 0.0 }
  0xe0   : > { %v367_v19 = vpop.f32.mrf.mxu0 }
  0xe1   : > { %v368_v27 = vadd.f32 %v367_v19, %v292_v17  ;;  %v379_v33 = vmax.f32 %v364_v24, 0.0  ;;  %v384_v44 = vpack.c.bf16 %v378_v40, %v376_v43 }
  0xe2   : > { %v369_v20 = vpop.f32.mrf.mxu0 }
  0xe3   : > { %v370_v25 = vadd.f32 %v369_v20, %v292_v17  ;;  %v380_v37 = vmax.f32 %v368_v27, 0.0  ;;  %v385_v42 = vpack.c.bf16 %v379_v33, %v377_v38 }
  0xe4   : > { %v371_v23 = vpop.f32.mrf.mxu0 }
  0xe5   : > { %v372_v26 = vadd.f32 %v371_v23, %v297_v22  ;;  %v381_v34 = vmax.f32 %v370_v25, 0.0 }
  0xe6   : > { %v373_v28 = vpop.f32.mrf.mxu0 }
  0xe7   : > { %v374_v30 = vadd.f32 %v373_v28, %v297_v22  ;;  %v382_v32 = vmax.f32 %v372_v26, 0.0 }
  0xe9   : > { %v383_v35 = vmax.f32 %v374_v30, 0.0  ;;  %v386_v41 = vpack.c.bf16 %v382_v32, %v380_v37 }
  0xeb   : > { %v387_v39 = vpack.c.bf16 %v383_v35, %v381_v34 }
  0xed   : > { %411 = vmatprep.subr.bf16.mxu1 %v387_v39 }
  0xee   : > { %412 = vmatpush1.bf16.msra.mxu1 %v386_v41 }
  0xef   : > { %413 = vmatprep.subr.bf16.mxu1 %v385_v42 }
  0xf2   : > { %414 = vmatpush1.bf16.msra.mxu1 %v384_v44 }
  0xf5   : > { %543 = vmatmul.mubr.msk.bf16.vlgmr.msra.gmra.mxu1 %vm395_vm2, %v388_v45 }
 0x1b5   : > { %v433_v47 = vpop.f32.mrf.mxu1 }
 0x1b6   : > { %v434_v48 = vadd.f32 %v433_v47, %v393_v46 }
 0x1b7   : > { %v435_v49 = vpop.f32.mrf.mxu1 }
 0x1b8   : > { %440 = vst [vmem:[%s262_s24] sm:$0x3f] %v434_v48  ;;  %v436_v50 = vadd.f32 %v435_v49, %v393_v46 }
 0x1b9   : > { %v437_v51 = vpop.f32.mrf.mxu1 }
 0x1ba   : > { %441 = vst [vmem:[%s262_s24 + $0x8] sm:$0x3f] %v436_v50 }
 0x1bb   : > { %v438_v52 = vpop.f32.mrf.mxu1 }
 0x1bc PF: > { %s15_s20 = sadd.s32 1, %s600_s20   ;;  %s700_s18 = smov %s596_s19 }
 0x1bd   : > { %p12_p5 = scmp.ge.s32.totalorder %s15_s20, 4   ;;  %s701_s19 = smov %s703_s21 }
 0x1bf   :  { %14 = sbr.rel (!%p12_p5) target bundleno = 2 (0x2), region = 70 }

</bundles_post_ra>
